<compile_context>
chip_gen: v6e
topology: v6e:2x2x1
jax: 0.10.0
libtpu: 0.0.40
codegen_flags: <defaults>
</compile_context>

<pallas_src>
import jax
import jax.numpy as jnp
from jax.experimental import pallas as pl
from jax.experimental.pallas import tpu as pltpu


def _ca_kernel(x_ref, w1_ref, b1_ref, w2_ref, b2_ref, o_ref):
    """Fused channel attention for a tile of Bt batch elements.

    x_ref : (Bt, C, HW)  feature maps, spatial on the 128-lane axis
    w1_ref: (C, mid)     fc1 weight, pre-transposed (PyTorch fc1.weight.T)
    b1_ref: (1, mid)     fc1 bias
    w2_ref: (C, mid)     fc2 weight (PyTorch fc2.weight layout, used as-is)
    b2_ref: (1, C)       fc2 bias
    o_ref : (Bt, C, HW)
    """
    # Global average pool over spatial positions -> (Bt, C).  f32 math even
    # when the HBM-resident feature map is bf16.
    y = jnp.mean(x_ref[...].astype(jnp.float32), axis=-1)

    # FC1 + ReLU on the VPU: h[b, j] = relu(sum_c y[b,c] * W1t[c,j] + b1[j]).
    h = jnp.sum(y[:, :, None] * w1_ref[...][None, :, :], axis=1) + b1_ref[...]
    h = jnp.maximum(h, 0.0)                                        # (Bt, mid)

    # FC2 + sigmoid on the VPU: s[b, c] = sigmoid(sum_j h[b,j]*W2[c,j] + b2[c]).
    s = jnp.sum(h[:, None, :] * w2_ref[...][None, :, :], axis=-1) + b2_ref[...]
    s = jax.nn.sigmoid(s)                                          # (Bt, C)

    # Rescale.  Re-read x from VMEM here (instead of keeping it live from the
    # pooling step) so vreg pressure stays flat as Bt grows.  The store is
    # lane-dense (last dim = full HW).
    o_ref[...] = (x_ref[...].astype(jnp.float32) * s[:, :, None]).astype(
        o_ref.dtype)


# ~1 MiB per (Bt, C, HW) block; in + out double-buffered => ~4 MiB of VMEM,
# safe on v5e/v6e (128 MiB) and on v7x (64 MiB physical, 32 MiB scoped).
_TARGET_BLOCK_BYTES = 1 << 20


def _pick_batch_tile(n, plane_bytes, target_bytes=_TARGET_BLOCK_BYTES):
    """Largest Bt that divides n, keeps the per-step block near target_bytes
    (amortizes per-grid-step overhead), and leaves >= 2 grid steps whenever
    n >= 2 so the 'parallel' batch axis can shard across v7x's two TCs."""
    cap = max(1, int(target_bytes) // max(int(plane_bytes), 1))
    if n >= 2:
        cap = min(cap, n // 2)
    cap = max(1, min(cap, n))
    for bt in range(cap, 0, -1):
        if n % bt == 0:
            return bt
    return 1


def channel_attention(x, fc1_w, fc1_b, fc2_w, fc2_b, *, donate_x=False):
    """Channel attention with the PyTorch module's parameter layout.

    x     : (N, C, H, W)  NCHW feature map (f32 or bf16)
    fc1_w : (C//r, C), fc1_b: (C//r,)   -- nn.Linear(C, C//r)
    fc2_w : (C, C//r), fc2_b: (C,)      -- nn.Linear(C//r, C)
    donate_x: alias the output onto x's HBM buffer (only if x is dead after).
    returns (N, C, H, W), same dtype as x.
    """
    N, C, H, W = x.shape
    mid = fc1_w.shape[0]
    HW = H * W

    # (N, C, H, W) -> (N, C, H*W): spatial goes on the lane axis (free reshape).
    xr = x.reshape(N, C, HW)

    # Pre-arrange the tiny FC params so the kernel needs no transposes; keep
    # the MLP math in f32 regardless of the feature-map dtype.
    f32 = jnp.float32
    w1t = jnp.transpose(fc1_w).astype(f32)     # (C, mid)
    b1r = fc1_b.reshape(1, mid).astype(f32)    # (1, mid)
    w2 = fc2_w.astype(f32)                     # (C, mid)
    b2r = fc2_b.reshape(1, C).astype(f32)      # (1, C)

    bt = _pick_batch_tile(N, C * HW * x.dtype.itemsize)
    grid = (N // bt,)

    out = pl.pallas_call(
        _ca_kernel,
        out_shape=jax.ShapeDtypeStruct((N, C, HW), x.dtype),
        grid=grid,
        in_specs=[
            pl.BlockSpec((bt, C, HW), lambda n: (n, 0, 0)),
            pl.BlockSpec((C, mid), lambda n: (0, 0)),
            pl.BlockSpec((1, mid), lambda n: (0, 0)),
            pl.BlockSpec((C, mid), lambda n: (0, 0)),
            pl.BlockSpec((1, C), lambda n: (0, 0)),
        ],
        out_specs=pl.BlockSpec((bt, C, HW), lambda n: (n, 0, 0)),
        compiler_params=pltpu.CompilerParams(
            dimension_semantics=("parallel",),
        ),
        input_output_aliases={0: 0} if donate_x else {},
    )(xr, w1t, b1r, w2, b2r)
    return out.reshape(N, C, H, W)


def channel_attention_ref(x, fc1_w, fc1_b, fc2_w, fc2_b):
    """Plain-JAX reference, mirrors the PyTorch forward exactly (f32 math)."""
    xf = x.astype(jnp.float32)
    y = jnp.mean(xf, axis=(2, 3))                                    # (N, C)
    h = jnp.maximum(y @ fc1_w.astype(jnp.float32).T + fc1_b, 0.0)    # (N, mid)
    s = jax.nn.sigmoid(h @ fc2_w.astype(jnp.float32).T + fc2_b)      # (N, C)
    return (xf * s[:, :, None, None]).astype(x.dtype)


if __name__ == "__main__":
    # Small configuration consistent with the module (default reduction=16).
    N, C, H, W = 2, 64, 16, 16
    reduction = 16
    mid = C // reduction

    key = jax.random.PRNGKey(0)
    k_x, k_w1, k_b1, k_w2, k_b2 = jax.random.split(key, 5)
    x = jax.random.normal(k_x, (N, C, H, W), jnp.float32)
    fc1_w = 0.1 * jax.random.normal(k_w1, (mid, C), jnp.float32)
    fc1_b = 0.1 * jax.random.normal(k_b1, (mid,), jnp.float32)
    fc2_w = 0.1 * jax.random.normal(k_w2, (C, mid), jnp.float32)
    fc2_b = 0.1 * jax.random.normal(k_b2, (C,), jnp.float32)

    fwd = jax.jit(channel_attention)

    # f32 HBM-boundary path.
    y = fwd(x, fc1_w, fc1_b, fc2_w, fc2_b)
    jax.block_until_ready(y)
    y_ref = channel_attention_ref(x, fc1_w, fc1_b, fc2_w, fc2_b)
    assert y.shape == (N, C, H, W), y.shape
    assert y.dtype == jnp.float32, y.dtype
    assert bool(jnp.all(jnp.isfinite(y)))
    assert bool(jnp.allclose(y, y_ref, rtol=1e-5, atol=1e-5)), float(
        jnp.max(jnp.abs(y - y_ref)))

    # bf16 HBM-boundary path (op is memory-bound; bf16 halves HBM traffic).
    xb = x.astype(jnp.bfloat16)
    yb = fwd(xb, fc1_w, fc1_b, fc2_w, fc2_b)
    jax.block_until_ready(yb)
    yb_ref = channel_attention_ref(xb, fc1_w, fc1_b, fc2_w, fc2_b)
    assert yb.shape == (N, C, H, W), yb.shape
    assert yb.dtype == jnp.bfloat16, yb.dtype
    assert bool(jnp.all(jnp.isfinite(yb.astype(jnp.float32))))
    assert bool(jnp.allclose(yb.astype(jnp.float32),
                             yb_ref.astype(jnp.float32),
                             rtol=2e-2, atol=2e-2))

    print("KERNEL_OK")
</pallas_src>

<mosaic_0001>
module attributes {stable_mosaic.version = 11 : i64} {
  func.func @_ca_kernel(%arg0: i32, %arg1: memref<1x64x256xf32, #tpu.memory_space<vmem>>, %arg2: memref<64x4xf32, #tpu.memory_space<vmem>>, %arg3: memref<1x4xf32, #tpu.memory_space<vmem>>, %arg4: memref<64x4xf32, #tpu.memory_space<vmem>>, %arg5: memref<1x64xf32, #tpu.memory_space<vmem>>, %arg6: memref<1x64x256xf32, #tpu.memory_space<vmem>>) attributes {dimension_semantics = [#tpu.dimension_semantics<parallel>], iteration_bounds = array<i64: 2>, scalar_prefetch = 0 : i64, scratch_operands = 0 : i64, tpu.core_type = #tpu.core_type<tc>, window_params = [{transform_indices = @transform_0, window_bounds = array<i64: 1, 64, 256>}, {pipeline_mode = #tpu.pipeline_mode<synchronous>, transform_indices = @transform_1, window_bounds = array<i64: 64, 4>}, {pipeline_mode = #tpu.pipeline_mode<synchronous>, transform_indices = @transform_2, window_bounds = array<i64: 1, 4>}, {pipeline_mode = #tpu.pipeline_mode<synchronous>, transform_indices = @transform_3, window_bounds = array<i64: 64, 4>}, {pipeline_mode = #tpu.pipeline_mode<synchronous>, transform_indices = @transform_4, window_bounds = array<i64: 1, 64>}, {transform_indices = @transform_5, window_bounds = array<i64: 1, 64, 256>}]} {
    %c0 = arith.constant 0 : index
    %c0_0 = arith.constant 0 : index
    %c0_1 = arith.constant 0 : index
    %0 = vector.load %arg1[%c0, %c0_0, %c0_1] : memref<1x64x256xf32, #tpu.memory_space<vmem>>, vector<1x64x256xf32>
    %cst = arith.constant dense<0.000000e+00> : vector<1x64xf32>
    %1 = vector.multi_reduction <add>, %0, %cst [2] : vector<1x64x256xf32> to vector<1x64xf32>
    %cst_2 = arith.constant 2.560000e+02 : f32
    %2 = vector.broadcast %cst_2 : f32 to vector<1x64xf32>
    %3 = arith.divf %1, %2 : vector<1x64xf32>
    %4 = vector.shape_cast %3 : vector<1x64xf32> to vector<1x64x1xf32>
    %c0_3 = arith.constant 0 : index
    %c0_4 = arith.constant 0 : index
    %5 = vector.load %arg2[%c0_3, %c0_4] : memref<64x4xf32, #tpu.memory_space<vmem>>, vector<64x4xf32>
    %6 = vector.shape_cast %5 : vector<64x4xf32> to vector<1x64x4xf32>
    %7 = vector.broadcast %4 : vector<1x64x1xf32> to vector<1x64x4xf32>
    %8 = arith.mulf %7, %6 : vector<1x64x4xf32>
    %cst_5 = arith.constant dense<0.000000e+00> : vector<1x4xf32>
    %9 = vector.multi_reduction <add>, %8, %cst_5 [1] : vector<1x64x4xf32> to vector<1x4xf32>
    %c0_6 = arith.constant 0 : index
    %c0_7 = arith.constant 0 : index
    %10 = vector.load %arg3[%c0_6, %c0_7] : memref<1x4xf32, #tpu.memory_space<vmem>>, vector<1x4xf32>
    %11 = arith.addf %9, %10 : vector<1x4xf32>
    %cst_8 = arith.constant 0.000000e+00 : f32
    %12 = vector.broadcast %cst_8 : f32 to vector<1x4xf32>
    %13 = arith.maximumf %11, %12 : vector<1x4xf32>
    %14 = vector.shape_cast %13 : vector<1x4xf32> to vector<1x1x4xf32>
    %c0_9 = arith.constant 0 : index
    %c0_10 = arith.constant 0 : index
    %15 = vector.load %arg4[%c0_9, %c0_10] : memref<64x4xf32, #tpu.memory_space<vmem>>, vector<64x4xf32>
    %16 = vector.shape_cast %15 : vector<64x4xf32> to vector<1x64x4xf32>
    %17 = vector.broadcast %14 : vector<1x1x4xf32> to vector<1x64x4xf32>
    %18 = arith.mulf %17, %16 : vector<1x64x4xf32>
    %cst_11 = arith.constant dense<0.000000e+00> : vector<1x64xf32>
    %19 = vector.multi_reduction <add>, %18, %cst_11 [2] : vector<1x64x4xf32> to vector<1x64xf32>
    %c0_12 = arith.constant 0 : index
    %c0_13 = arith.constant 0 : index
    %20 = vector.load %arg5[%c0_12, %c0_13] : memref<1x64xf32, #tpu.memory_space<vmem>>, vector<1x64xf32>
    %21 = arith.addf %19, %20 : vector<1x64xf32>
    %22 = arith.negf %21 : vector<1x64xf32>
    %23 = math.exp %22 : vector<1x64xf32>
    %cst_14 = arith.constant 1.000000e+00 : f32
    %24 = vector.broadcast %cst_14 : f32 to vector<1x64xf32>
    %25 = arith.addf %24, %23 : vector<1x64xf32>
    %26 = arith.divf %24, %25 : vector<1x64xf32>
    %c0_15 = arith.constant 0 : index
    %c0_16 = arith.constant 0 : index
    %c0_17 = arith.constant 0 : index
    %27 = vector.load %arg1[%c0_15, %c0_16, %c0_17] : memref<1x64x256xf32, #tpu.memory_space<vmem>>, vector<1x64x256xf32>
    %28 = vector.shape_cast %26 : vector<1x64xf32> to vector<1x64x1xf32>
    %29 = vector.broadcast %28 : vector<1x64x1xf32> to vector<1x64x256xf32>
    %30 = arith.mulf %27, %29 : vector<1x64x256xf32>
    %c0_18 = arith.constant 0 : index
    %c0_19 = arith.constant 0 : index
    %c0_20 = arith.constant 0 : index
    %31 = vector.load %arg6[%c0_18, %c0_19, %c0_20] : memref<1x64x256xf32, #tpu.memory_space<vmem>>, vector<1x64x256xf32>
    tpu.vector_store %arg6[%c0_18, %c0_19, %c0_20], %30 {strides = array<i32>} : memref<1x64x256xf32, #tpu.memory_space<vmem>>, vector<1x64x256xf32>,
    return
  }
  func.func @transform_0(%arg0: i32) -> (i32, i32, i32) {
    %c0_i32 = arith.constant 0 : i32
    %c0_i32_0 = arith.constant 0 : i32
    %c0_i32_1 = arith.constant 0 : i32
    return %arg0, %c0_i32, %c0_i32_0 : i32, i32, i32
  }
  func.func @transform_1(%arg0: i32) -> (i32, i32) {
    %c0_i32 = arith.constant 0 : i32
    %c0_i32_0 = arith.constant 0 : i32
    %c0_i32_1 = arith.constant 0 : i32
    return %c0_i32, %c0_i32_0 : i32, i32
  }
  func.func @transform_2(%arg0: i32) -> (i32, i32) {
    %c0_i32 = arith.constant 0 : i32
    %c0_i32_0 = arith.constant 0 : i32
    %c0_i32_1 = arith.constant 0 : i32
    return %c0_i32, %c0_i32_0 : i32, i32
  }
  func.func @transform_3(%arg0: i32) -> (i32, i32) {
    %c0_i32 = arith.constant 0 : i32
    %c0_i32_0 = arith.constant 0 : i32
    %c0_i32_1 = arith.constant 0 : i32
    return %c0_i32, %c0_i32_0 : i32, i32
  }
  func.func @transform_4(%arg0: i32) -> (i32, i32) {
    %c0_i32 = arith.constant 0 : i32
    %c0_i32_0 = arith.constant 0 : i32
    %c0_i32_1 = arith.constant 0 : i32
    return %c0_i32, %c0_i32_0 : i32, i32
  }
  func.func @transform_5(%arg0: i32) -> (i32, i32, i32) {
    %c0_i32 = arith.constant 0 : i32
    %c0_i32_0 = arith.constant 0 : i32
    %c0_i32_1 = arith.constant 0 : i32
    return %arg0, %c0_i32, %c0_i32_0 : i32, i32, i32
  }
}

</mosaic_0001>

<bundles_post_ra>
// kernel: channel_attention.1
= control target key start
LH: loop header
LB: loop body
LE: loop exit
PB: predicated region body
PF: predicated region fallthrough
CT: control target
= control target key end

     0   :  { %s691_s18 = smov 0   ;;  %s877_s0 = inlined_call_operand.vmem [shape: f32[2,64,256], index: 0, kind: input, shape index: {}]   ;;  %s878_s1 = inlined_call_operand.vmem [shape: f32[64,4], index: 1, kind: input, shape index: {}]   ;;  %s879_s2 = inlined_call_operand.vmem [shape: f32[1,4], index: 2, kind: input, shape index: {}]   ;;  %s880_s3 = inlined_call_operand.vmem [shape: f32[64,4], index: 3, kind: input, shape index: {}]   ;;  %s881_s4 = inlined_call_operand.vmem [shape: f32[1,64], index: 4, kind: input, shape index: {}]   ;;  %s882_s5 = inlined_call_operand.vmem [shape: f32[2,64,256], index: 5, kind: output, shape index: {}]  }
   0x1 LB: > { %s587_s19 = sadd.s32 4294967295, %s658_s18   ;;  %p591_p0 = scmp.ge.s32.totalorder %s658_s18, 1  ;;  %s658_s18 = sphi %s691_s18, %s15_s18  }
   0x2   : > { %p187_p1 = scmp.lt.s32.totalorder %s658_s18, 3 }
   0x4   : > { %p188_p2 = pnand %p591_p0, %p187_p1 }
   0x5   : > { %p215_p3 = scmp.lt.s32.totalorder (!%p188_p2), %s587_s19, 1 }
   0x6   : > { %191 = sbr.rel (%p188_p2) target bundleno = 517 (0x205), region = 40 }
   0xb   : > { %s884_s19 = smov (!%p215_p3, %s587_s19), 1  ;;  %v758_v24 = vld [vmem:[%s881_s4] ss:$0 sm:$0xff]  ;;  %v276_v30 = vld [vmem:[%s878_s1 + $0x10] sm:$0xff]  ;;  %v275_v31 = vld [vmem:[%s878_s1 + $0x8] sm:$0xff]  ;;  %vm290_vm0 = vcmask 31744  }
   0xc   : > { %s607_s20 = sshll.u32 %s884_s19, 7  ;;  %v274_v28 = vld [vmem:[%s878_s1] sm:$0xff]  ;;  %v277_v35 = vld [vmem:[%s878_s1 + $0x18] sm:$0xff]  ;;  %v279_v46 = vld [vmem:[%s878_s1 + $0x28] sm:$0xff] }
   0xd   : > { %s219_s23 = scalar_lea.vmem %s877_s0, %s607_s20  ;;  %v278_v41 = vld [vmem:[%s878_s1 + $0x20] sm:$0xff]  ;;  %v280_v55 = vld [vmem:[%s878_s1 + $0x30] sm:$0xff]  ;;  %v281_v59 = vld [vmem:[%s878_s1 + $0x38] sm:$0xff]  ;;  %s840_s15 = scalar_lea.vmem %s882_s5, %s607_s20 }
   0xe   : > { %v707_v0 = vld [vmem:[%s219_s23] sm:$0xff]  ;;  %v709_v1 = vld [vmem:[%s219_s23 + $0x8] sm:$0xff]  ;;  %v717_v5 = vld [vmem:[%s219_s23 + $0x10] sm:$0xff] }
   0xf   : > { %v711_v2 = vld [vmem:[%s219_s23 + $0x20] sm:$0xff]  ;;  %v241_v3 = vadd.f32 %v709_v1, %v707_v0  ;;  %v715_v4 = vld [vmem:[%s219_s23 + $0x28] sm:$0xff]  ;;  %v719_v6 = vld [vmem:[%s219_s23 + $0x18] sm:$0xff] }
  0x10   : > { %v247_v7 = vadd.f32 %v715_v4, %v711_v2  ;;  %v723_v8 = vld [vmem:[%s219_s23 + $0x30] sm:$0xff]  ;;  %v725_v9 = vld [vmem:[%s219_s23 + $0x38] sm:$0xff]  ;;  %v244_v10 = vadd.f32 %v719_v6, %v717_v5  ;;  %v731_v12 = vld [vmem:[%s219_s23 + $0x40] sm:$0xff] }
  0x11   : > { %242 = vadd.xlane.f32.xlu0 %v241_v3  ;;  %v250_v11 = vadd.f32 %v725_v9, %v723_v8  ;;  %v733_v13 = vld [vmem:[%s219_s23 + $0x48] sm:$0xff]  ;;  %v735_v14 = vld [vmem:[%s219_s23 + $0x50] sm:$0xff]  ;;  %v737_v15 = vld [vmem:[%s219_s23 + $0x58] sm:$0xff] }
  0x12   : > { %248 = vadd.xlane.f32.xlu1 %v247_v7  ;;  %v253_v16 = vadd.f32 %v733_v13, %v731_v12  ;;  %v256_v17 = vadd.f32 %v737_v15, %v735_v14  ;;  %v743_v18 = vld [vmem:[%s219_s23 + $0x60] sm:$0xff]  ;;  %v745_v19 = vld [vmem:[%s219_s23 + $0x68] sm:$0xff]  ;;  %v747_v20 = vld [vmem:[%s219_s23 + $0x70] sm:$0xff] }
  0x13   : > { %v749_v21 = vld [vmem:[%s219_s23 + $0x78] sm:$0xff]  ;;  %v259_v22 = vadd.f32 %v745_v19, %v743_v18 }
  0x14   : > { %v262_v23 = vadd.f32 %v749_v21, %v747_v20 }
  0x15   : > { %245 = vadd.xlane.f32.xlu0 %v244_v10 }
  0x16   : > { %251 = vadd.xlane.f32.xlu1 %v250_v11 }
  0x19   : > { %254 = vadd.xlane.f32.xlu0 %v253_v16 }
  0x1a   : > { %257 = vadd.xlane.f32.xlu1 %v256_v17 }
  0x1d   : > { %260 = vadd.xlane.f32.xlu0 %v259_v22 }
  0x1e   : > { %263 = vadd.xlane.f32.xlu1 %v262_v23 }
  0x2f   : > { %370 = vbcast.lane.b32.xlu1 %v758_v24, 264 }
  0x33   : > { %374 = vbcast.lane.b32.xlu1 %v758_v24, 272  ;;  %366 = vbcast.lane.b32.xlu0 %v758_v24, 256 }
  0x37   : > { %378 = vbcast.lane.b32.xlu1 %v758_v24, 280  ;;  %382 = vbcast.lane.b32.xlu0 %v758_v24, 288 }
  0x3b   : > { %386 = vbcast.lane.b32.xlu1 %v758_v24, 296 }
  0x9a   : > { %v243_v25 = vpop.xlane.xlu0 %242 }
  0x9b   : > { %v266_v26 = vmul.f32 0.00390625, %v243_v25  ;;  %v249_v27 = vpop.xlane.xlu1 %248 }
  0x9c   : > { %v268_v29 = vmul.f32 0.00390625, %v249_v27  ;;  %v323_v27 = vlaneseq }
  0x9d   : > { %v282_v33 = vmul.f32 %v274_v28, %v266_v26 }
  0x9e   : > { %v246_v32 = vpop.xlane.xlu0 %245  ;;  %v284_v38 = vmul.f32 %v276_v30, %v268_v29  ;;  %v324_v30 = vshrl.u32 %v323_v27, 7 }
  0x9f   : > { %v267_v34 = vmul.f32 0.00390625, %v246_v32  ;;  %v252_v36 = vpop.xlane.xlu1 %251  ;;  %v291_v43 = vsel %vm290_vm0, %v282_v33, 0.0  ;;  %v312_v32 = vld [vmem:[%s879_s2] sm:$0x1] }
  0xa0   : > { %v269_v37 = vmul.f32 0.00390625, %v252_v36  ;;  %v294_v50 = vsel %vm290_vm0, %v284_v38, 0.0  ;;  %v315_v38 = vld [vmem:[%s880_s3] sm:$0xff] }
  0xa1   : > { %v283_v39 = vmul.f32 %v275_v31, %v267_v34  ;;  %v325_v34 = vsub.s32 0, %v324_v30 }
  0xa2   : > { %v285_v40 = vmul.f32 %v277_v35, %v269_v37  ;;  %v255_v42 = vpop.xlane.xlu0 %254  ;;  %v316_v37 = vld [vmem:[%s880_s3 + $0x8] sm:$0xff] }
  0xa3   : > { %v292_v44 = vsel %vm290_vm0, %v283_v39, 0.0  ;;  %v270_v45 = vmul.f32 0.00390625, %v255_v42  ;;  %v258_v47 = vpop.xlane.xlu1 %257 }
  0xa4   : > { %v293_v48 = vadd.f32 %v292_v44, %v291_v43  ;;  %v271_v49 = vmul.f32 0.00390625, %v258_v47  ;;  %v296_v51 = vsel %vm290_vm0, %v285_v40, 0.0  ;;  %v318_v40 = vld [vmem:[%s880_s3 + $0x18] sm:$0xff] }
  0xa5   : > { %v286_v52 = vmul.f32 %v278_v41, %v270_v45  ;;  %v317_v41 = vld [vmem:[%s880_s3 + $0x10] sm:$0xff] }
  0xa6   : > { %v295_v53 = vadd.f32 %v294_v50, %v293_v48  ;;  %v287_v54 = vmul.f32 %v279_v46, %v271_v49  ;;  %v261_v56 = vpop.xlane.xlu0 %260  ;;  %v320_v48 = vld [vmem:[%s880_s3 + $0x28] sm:$0xff]  ;;  %v319_v49 = vld [vmem:[%s880_s3 + $0x20] sm:$0xff] }
  0xa7   : > { %v298_v57 = vsel %vm290_vm0, %v286_v52, 0.0  ;;  %v272_v58 = vmul.f32 0.00390625, %v261_v56  ;;  %v264_v60 = vpop.xlane.xlu1 %263 }
  0xa8   : > { %v297_v61 = vadd.f32 %v296_v51, %v295_v53  ;;  %v273_v62 = vmul.f32 0.00390625, %v264_v60  ;;  %v300_v63 = vsel %vm290_vm0, %v287_v54, 0.0  ;;  %v322_v54 = vld [vmem:[%s880_s3 + $0x38] sm:$0xff] }
  0xa9   : > { %v288_v3 = vmul.f32 %v280_v55, %v272_v58  ;;  %v321_v55 = vld [vmem:[%s880_s3 + $0x30] sm:$0xff] }
  0xaa   : > { %v299_v7 = vadd.f32 %v298_v57, %v297_v61  ;;  %v289_v10 = vmul.f32 %v281_v59, %v273_v62  ;;  %v660_v62 = vmov 0  }
  0xab   : > { %v302_v11 = vsel %vm290_vm0, %v288_v3, 0.0  ;;  %619 = vset.pattern.permute.xlu1 %v660_v62  ;;  %618 = vset.pattern.permute.xlu0 %v660_v62 }
  0xac   : > { %v301_v16 = vadd.f32 %v300_v63, %v299_v7  ;;  %v304_v17 = vsel %vm290_vm0, %v289_v10, 0.0  ;;  %v371_v63 = vpop.permute.xlu1 %370  ;;  %v367_v10 = vpop.permute.xlu0 %366 }
  0xae   : > { %v303_v22 = vadd.f32 %v302_v11, %v301_v16 }
  0xb0   : > { %v305_v23 = vadd.f32 %v304_v17, %v303_v22  ;;  %v375_v3 = vpop.permute.xlu1 %374  ;;  %v383_v16 = vpop.permute.xlu0 %382 }
  0xb2   : > { %v306_v25 = vrot.slane %v305_v23, 4 }
  0xb4   : > { %v307_v26 = vadd.f32 %v306_v25, %v305_v23  ;;  %v379_v7 = vpop.permute.xlu1 %378 }
  0xb6   : > { %v308_v28 = vrot.slane %v307_v26, 2 }
  0xb8   : > { %v309_v29 = vadd.f32 %v308_v28, %v307_v26  ;;  %v387_v11 = vpop.permute.xlu1 %386 }
  0xba   : > { %v310_v31 = vrot.slane %v309_v29, 1 }
  0xbc   : > { %v311_v33 = vadd.f32 %v310_v31, %v309_v29 }
  0xbe   : > { %v313_v35 = vadd.f32 %v312_v32, %v311_v33 }
  0xc0   : > { %v314_v36 = vmax.f32 %v313_v35, 0.0 }
  0xc2   : > { %v326_v39 = vrot.slane %v314_v36, %v325_v34 }
  0xc4   : > { %v328_v42 = vmul.f32 %v326_v39, %v316_v37  ;;  %v327_v43 = vmul.f32 %v326_v39, %v315_v38  ;;  %v330_v46 = vmul.f32 %v326_v39, %v318_v40  ;;  %v329_v47 = vmul.f32 %v326_v39, %v317_v41 }
  0xc5   : > { %v332_v52 = vmul.f32 %v326_v39, %v320_v48  ;;  %v331_v53 = vmul.f32 %v326_v39, %v319_v49  ;;  %v334_v58 = vmul.f32 %v326_v39, %v322_v54  ;;  %v333_v59 = vmul.f32 %v326_v39, %v321_v55 }
  0xc6   : > { %v338_v44 = vsel %vm290_vm0, %v328_v42, 0.0  ;;  %v335_v45 = vsel %vm290_vm0, %v327_v43, 0.0  ;;  %v344_v50 = vsel %vm290_vm0, %v330_v46, 0.0  ;;  %v341_v51 = vsel %vm290_vm0, %v329_v47, 0.0 }
  0xc7   : > { %339 = vadd.xlane.f32.xlu1 %v338_v44  ;;  %336 = vadd.xlane.f32.xlu0 %v335_v45  ;;  %v350_v56 = vsel %vm290_vm0, %v332_v52, 0.0  ;;  %v347_v57 = vsel %vm290_vm0, %v331_v53, 0.0  ;;  %v356_v60 = vsel %vm290_vm0, %v334_v58, 0.0  ;;  %v353_v61 = vsel %vm290_vm0, %v333_v59, 0.0 }
  0xcb   : > { %345 = vadd.xlane.f32.xlu1 %v344_v50  ;;  %342 = vadd.xlane.f32.xlu0 %v341_v51 }
  0xcf   : > { %351 = vadd.xlane.f32.xlu1 %v350_v56  ;;  %348 = vadd.xlane.f32.xlu0 %v347_v57 }
  0xd3   : > { %357 = vadd.xlane.f32.xlu1 %v356_v60  ;;  %354 = vadd.xlane.f32.xlu0 %v353_v61 }
  0xe4   : > { %394 = vbcast.lane.b32.xlu1 %v758_v24, 312 }
  0xe9   : > { %390 = vbcast.lane.b32.xlu0 %v758_v24, 304 }
 0x150   : > { %v340_v17 = vpop.xlane.xlu1 %339  ;;  %v337_v22 = vpop.xlane.xlu0 %336 }
 0x151   : > { %v405_v23 = vadd.f32 %v371_v63, %v340_v17  ;;  %v404_v25 = vadd.f32 %v367_v10, %v337_v22 }
 0x153   : > { %v598_v26 = vmul.f32 -1.442695, %v405_v23  ;;  %v597_v27 = vmul.f32 -1.442695, %v404_v25 }
 0x154   : > { %v346_v28 = vpop.xlane.xlu1 %345  ;;  %v343_v29 = vpop.xlane.xlu0 %342 }
 0x155   : > { %620 = vpow2.f32 %v598_v26  ;;  %v407_v30 = vadd.f32 %v379_v7, %v346_v28  ;;  %v406_v24 = vadd.f32 %v375_v3, %v343_v29 }
 0x156   : > { %622 = vpow2.f32 %v597_v27 }
 0x157   : > { %v600_v31 = vmul.f32 -1.442695, %v407_v30  ;;  %v599_v32 = vmul.f32 -1.442695, %v406_v24 }
 0x158   : > { %v352_v33 = vpop.xlane.xlu1 %351  ;;  %v349_v34 = vpop.xlane.xlu0 %348 }
 0x159   : > { %624 = vpow2.f32 %v600_v31  ;;  %v409_v35 = vadd.f32 %v387_v11, %v352_v33  ;;  %v408_v36 = vadd.f32 %v383_v16, %v349_v34 }
 0x15a   : > { %626 = vpow2.f32 %v599_v32 }
 0x15b   : > { %v602_v37 = vmul.f32 -1.442695, %v409_v35  ;;  %v601_v38 = vmul.f32 -1.442695, %v408_v36 }
 0x15c   : > { %v358_v39 = vpop.xlane.xlu1 %357  ;;  %v355_v40 = vpop.xlane.xlu0 %354 }
 0x15d   : > { %628 = vpow2.f32 %v602_v37 }
 0x15e   : > { %630 = vpow2.f32 %v601_v38 }
 0x160   : > { %v395_v41 = vpop.permute.xlu1 %394  ;;  %v391_v42 = vpop.permute.xlu0 %390 }
 0x161   : > { %v411_v43 = vadd.f32 %v395_v41, %v358_v39  ;;  %v410_v44 = vadd.f32 %v391_v42, %v355_v40 }
 0x162   : > { %v621_v45 = vpop.eup %620 }
 0x163   : > { %v623_v46 = vpop.eup %622  ;;  %v437_v47 = vadd.f32 1.0, %v621_v45  ;;  %v604_v48 = vmul.f32 -1.442695, %v411_v43  ;;  %v603_v50 = vmul.f32 -1.442695, %v410_v44 }
 0x164   : > { %v436_v49 = vadd.f32 1.0, %v623_v46 }
 0x165   : > { %632 = vrcp.f32 %v437_v47 }
 0x166   : > { %v625_v51 = vpop.eup %624  ;;  %634 = vrcp.f32 %v436_v49 }
 0x167   : > { %v627_v52 = vpop.eup %626  ;;  %v439_v53 = vadd.f32 1.0, %v625_v51  ;;  %636 = vpow2.f32 %v604_v48 }
 0x168   : > { %v438_v54 = vadd.f32 1.0, %v627_v52  ;;  %638 = vpow2.f32 %v603_v50 }
 0x169   : > { %640 = vrcp.f32 %v439_v53 }
 0x16a   : > { %v629_v55 = vpop.eup %628  ;;  %642 = vrcp.f32 %v438_v54 }
 0x16b   : > { %v631_v56 = vpop.eup %630  ;;  %v441_v57 = vadd.f32 1.0, %v629_v55 }
 0x16c   : > { %v440_v58 = vadd.f32 1.0, %v631_v56 }
 0x16d   : > { %644 = vrcp.f32 %v441_v57 }
 0x16e   : > { %646 = vrcp.f32 %v440_v58 }
 0x172   : > { %v633_v59 = vpop.eup %632 }
 0x173   : > { %v635_v60 = vpop.eup %634  ;;  %467 = vperm.xlu1 %619, %v633_v59  }
 0x174   : > { %v637_v61 = vpop.eup %636  ;;  %462 = vperm.xlu0 %618, %v635_v60  }
 0x175   : > { %v639_v62 = vpop.eup %638  ;;  %v443_v63 = vadd.f32 1.0, %v637_v61 }
 0x176   : > { %v641_v3 = vpop.eup %640  ;;  %v442_v7 = vadd.f32 1.0, %v639_v62 }
 0x177   : > { %v643_v10 = vpop.eup %642  ;;  %648 = vrcp.f32 %v443_v63 }
 0x178   : > { %650 = vrcp.f32 %v442_v7  ;;  %477 = vperm.xlu0 %618, %v641_v3   ;;  %472 = vperm.xlu1 %619, %v643_v10  }
 0x17a   : > { %v645_v11 = vpop.eup %644 }
 0x17b   : > { %v647_v16 = vpop.eup %646 }
 0x17c   : > { %487 = vperm.xlu0 %618, %v645_v11   ;;  %482 = vperm.xlu1 %619, %v647_v16  }
 0x184   : > { %v649_v17 = vpop.eup %648 }
 0x185   : > { %v651_v22 = vpop.eup %650  ;;  %497 = vperm.xlu0 %618, %v649_v17  }
 0x186   : > { %492 = vperm.xlu1 %619, %v651_v22  }
 0x1ee   : > { %v468_v23 = vpop.permute.xlu1 %467 }
 0x1ef   : > { %v502_v25 = vmul.f32 %v468_v23, %v717_v5  ;;  %v503_v26 = vmul.f32 %v468_v23, %v719_v6  ;;  %v463_v27 = vpop.permute.xlu0 %462 }
 0x1f0   : > { %v500_v28 = vmul.f32 %v463_v27, %v707_v0  ;;  %v501_v29 = vmul.f32 %v463_v27, %v709_v1 }
 0x1f1   : > { %518 = vst [vmem:[%s840_s15 + $0x10] sm:$0xff] %v502_v25  ;;  %519 = vst [vmem:[%s840_s15 + $0x18] sm:$0xff] %v503_v26 }
 0x1f2   : > { %516 = vst [vmem:[%s840_s15] sm:$0xff] %v500_v28  ;;  %517 = vst [vmem:[%s840_s15 + $0x8] sm:$0xff] %v501_v29 }
 0x1f3   : > { %v473_v30 = vpop.permute.xlu1 %472  ;;  %v478_v24 = vpop.permute.xlu0 %477 }
 0x1f4   : > { %v504_v5 = vmul.f32 %v473_v30, %v711_v2  ;;  %v505_v6 = vmul.f32 %v473_v30, %v715_v4  ;;  %v506_v31 = vmul.f32 %v478_v24, %v723_v8  ;;  %v507_v0 = vmul.f32 %v478_v24, %v725_v9 }
 0x1f6   : > { %520 = vst [vmem:[%s840_s15 + $0x20] sm:$0xff] %v504_v5  ;;  %521 = vst [vmem:[%s840_s15 + $0x28] sm:$0xff] %v505_v6 }
 0x1f7   : > { %522 = vst [vmem:[%s840_s15 + $0x30] sm:$0xff] %v506_v31  ;;  %523 = vst [vmem:[%s840_s15 + $0x38] sm:$0xff] %v507_v0  ;;  %v483_v1 = vpop.permute.xlu1 %482  ;;  %v488_v32 = vpop.permute.xlu0 %487 }
 0x1f8   : > { %v508_v33 = vmul.f32 %v483_v1, %v731_v12  ;;  %v509_v2 = vmul.f32 %v483_v1, %v733_v13  ;;  %v510_v4 = vmul.f32 %v488_v32, %v735_v14  ;;  %v511_v8 = vmul.f32 %v488_v32, %v737_v15 }
 0x1fa   : > { %524 = vst [vmem:[%s840_s15 + $0x40] sm:$0xff] %v508_v33  ;;  %525 = vst [vmem:[%s840_s15 + $0x48] sm:$0xff] %v509_v2 }
 0x1fb   : > { %526 = vst [vmem:[%s840_s15 + $0x50] sm:$0xff] %v510_v4  ;;  %527 = vst [vmem:[%s840_s15 + $0x58] sm:$0xff] %v511_v8 }
 0x200   : > { %v498_v9 = vpop.permute.xlu0 %497 }
 0x201   : > { %v493_v34 = vpop.permute.xlu1 %492  ;;  %v514_v35 = vmul.f32 %v498_v9, %v747_v20  ;;  %v515_v36 = vmul.f32 %v498_v9, %v749_v21 }
 0x202   : > { %v512_v12 = vmul.f32 %v493_v34, %v743_v18  ;;  %v513_v37 = vmul.f32 %v493_v34, %v745_v19 }
 0x203   : > { %530 = vst [vmem:[%s840_s15 + $0x70] sm:$0xff] %v514_v35  ;;  %531 = vst [vmem:[%s840_s15 + $0x78] sm:$0xff] %v515_v36 }
 0x204   : > { %528 = vst [vmem:[%s840_s15 + $0x60] sm:$0xff] %v512_v12  ;;  %529 = vst [vmem:[%s840_s15 + $0x68] sm:$0xff] %v513_v37 }
 0x205 PF: > { %s15_s18 = sadd.s32 1, %s658_s18  }
 0x206   : > { %p12_p4 = scmp.ge.s32.totalorder %s15_s18, 4  }
 0x208   :  { %14 = sbr.rel (!%p12_p4) target bundleno = 1 (0x1), region = 70 }

</bundles_post_ra>
